<compile_context>
chip_gen: v7x
topology: tpu7x:2x2x1
jax: 0.10.0
libtpu: 0.0.40
codegen_flags: <defaults>
</compile_context>

<pallas_src>
import functools

import numpy as np

import jax
import jax.numpy as jnp
from jax.experimental import pallas as pl
from jax.experimental.pallas import tpu as pltpu


# VMEM working-set budget (double-buffered input tiles + tile-sized temporaries)
# and the scoped-VMEM limit requested from the compiler.  40 MiB is safe on all
# generations (v5e/v6e: 128 MiB physical VMEM, v7x: 64 MiB physical).
_VMEM_WORKSET_BYTES = 28 * 1024 * 1024
_VMEM_LIMIT_BYTES = 40 * 1024 * 1024


def _round_up(x, m):
    return (x + m - 1) // m * m


def _sublane_multiple(dtype):
    return {4: 8, 2: 16, 1: 32}.get(jnp.dtype(dtype).itemsize, 8)


def _write_partial(o_ref, partial):
    """Write scalar `partial` into o_ref[0,0,0] and zero the rest of the
    (1, 8, 128) output block (Pallas does not zero-init output blocks)."""
    sub = jax.lax.broadcasted_iota(jnp.int32, (1, 8, 128), 1)
    lane = jax.lax.broadcasted_iota(jnp.int32, (1, 8, 128), 2)
    o_ref[...] = jnp.where((sub == 0) & (lane == 0), partial, 0.0)


def _row_norm_kernel(x_ref, o_ref, *, n_rows, tb, needs_mask):
    """Plain layout: one logical row per sublane row.  x_ref: [tb, pre_k]."""
    i = pl.program_id(0)
    x = x_ref[...].astype(jnp.float32)                     # f32 accumulation (v5e-friendly)
    row_sq = jnp.sum(x * x, axis=1, keepdims=True)         # [tb, 1]
    norms = jnp.sqrt(jnp.maximum(row_sq, 0.0))             # [tb, 1]
    if needs_mask:
        # Ragged last tile: OOB rows hold garbage (possibly Inf/NaN) -> select.
        row = i * tb + jax.lax.broadcasted_iota(jnp.int32, (tb, 1), 0)
        norms = jnp.where(row < n_rows, norms, 0.0)
    _write_partial(o_ref, jnp.sum(norms))


def _packed_norm_kernel(x_ref, seg_ref, o_ref, *, n_rows, tb, needs_mask):
    """Lane-dense layout: r = 128 // pre_k logical rows per 128-lane physical row.
    x_ref: [tb, 128]; seg_ref: [128, r] exact 0/1 segment-sum matrix (bf16)."""
    i = pl.program_id(0)
    x = x_ref[...].astype(jnp.float32)
    sq = x * x                                              # [tb, 128] f32
    # Exact-ish hi/lo bf16 split of sq against the exact 0/1 seg matrix:
    # two native bf16 MXU passes (vs 6 for Precision.HIGHEST) keep the kernel
    # HBM-bound while preserving ~f32 accuracy of the row sums-of-squares.
    sq_hi = sq.astype(jnp.bfloat16)
    sq_lo = (sq - sq_hi.astype(jnp.float32)).astype(jnp.bfloat16)
    seg = seg_ref[...]
    row_sq = (jnp.dot(sq_hi, seg, preferred_element_type=jnp.float32)
              + jnp.dot(sq_lo, seg, preferred_element_type=jnp.float32))  # [tb, r]
    norms = jnp.sqrt(jnp.maximum(row_sq, 0.0))              # [tb, r]
    if needs_mask:
        # Mask post-reduction: [tb, 1] broadcast over r, not the [tb, 128] sq.
        row = i * tb + jax.lax.broadcasted_iota(jnp.int32, (tb, 1), 0)
        norms = jnp.where(row < n_rows, norms, 0.0)
    _write_partial(o_ref, jnp.sum(norms))


def normal_loss(normal_scores, *, max_tile_rows=None):
    """normal_scores: [bs, pre_k] -> scalar f32 (mean of per-row L2 norms)."""
    bs, pre_k = normal_scores.shape
    itemsize = jnp.dtype(normal_scores.dtype).itemsize
    sublane = _sublane_multiple(normal_scores.dtype)
    inv_bs = 1.0 / bs

    # Lane-dense packing: pre_k divides 128 and the row-major reshape is exact
    # (bs multiple of r = 128 // pre_k) -> the reshape is free (no copy).
    r = 128 // pre_k if (pre_k < 128 and 128 % pre_k == 0) else 1
    use_packed = (r > 1) and (bs % r == 0)

    if use_packed:
        n_rows = (bs * pre_k) // 128
        lane_pad = 128
        blk_k = 128
        x = normal_scores.reshape(n_rows, 128)
        # Compile-time segment-sum matrix: lane l contributes to segment l // pre_k.
        seg = jnp.asarray(np.kron(np.eye(r, dtype=np.float32),
                                  np.ones((pre_k, 1), dtype=np.float32)),
                          dtype=jnp.bfloat16)               # [128, r], exact 0/1
    else:
        n_rows = bs
        lane_pad = _round_up(max(pre_k, 1), 128)             # padded lane footprint in VMEM
        blk_k = pre_k
        x = normal_scores
        seg = None

    # Tile rows: biggest tile whose double-buffered (native dtype) input plus
    # in-kernel temporaries fit the VMEM working-set budget, rounded to the
    # dtype's sublane multiple.
    if n_rows >= sublane:
        temps = 8 if itemsize == 4 else 12                    # f32/bf16 temporaries per element
        row_cost = lane_pad * (2 * itemsize + temps)
        tb_cap = max(sublane, (_VMEM_WORKSET_BYTES // row_cost) // sublane * sublane)
        if max_tile_rows is not None:
            tb_cap = max(sublane, min(tb_cap, _round_up(max_tile_rows, sublane)))
        tb = min(tb_cap, _round_up(n_rows, sublane))
    else:
        tb = n_rows                                           # tiny case: full-array block
    n_tiles = pl.cdiv(n_rows, tb)
    needs_mask = (n_tiles * tb != n_rows)

    if use_packed:
        kernel = functools.partial(_packed_norm_kernel, n_rows=n_rows, tb=tb,
                                   needs_mask=needs_mask)
        in_specs = [pl.BlockSpec((tb, blk_k), lambda i: (i, 0)),
                    pl.BlockSpec((128, r), lambda i: (0, 0))]
        args = (x, seg)
    else:
        kernel = functools.partial(_row_norm_kernel, n_rows=n_rows, tb=tb,
                                   needs_mask=needs_mask)
        in_specs = [pl.BlockSpec((tb, blk_k), lambda i: (i, 0))]
        args = (x,)

    # Each grid step writes its partial sum into its own (1, 8, 128) output block
    # -> fully independent tiles, so the axis can be "parallel" (both v7x cores).
    partials = pl.pallas_call(
        kernel,
        out_shape=jax.ShapeDtypeStruct((n_tiles, 8, 128), jnp.float32),
        grid=(n_tiles,),
        in_specs=in_specs,
        out_specs=pl.BlockSpec((1, 8, 128), lambda i: (i, 0, 0)),
        compiler_params=pltpu.CompilerParams(
            dimension_semantics=("parallel",),
            vmem_limit_bytes=_VMEM_LIMIT_BYTES),
        cost_estimate=pl.CostEstimate(
            flops=int(3 * bs * max(pre_k, 1)),
            transcendentals=int(bs),
            bytes_accessed=int(bs * pre_k * itemsize + n_tiles * 8 * 128 * 4)),
    )(*args)

    # Tiny cross-tile reduce + compile-time 1/bs scale in the wrapper.
    return jnp.sum(partials) * inv_bs


if __name__ == "__main__":
    k1, k2, k3 = jax.random.split(jax.random.PRNGKey(0), 3)

    def ref_loss(v):
        v = v.astype(jnp.float32)
        return jnp.mean(jnp.sqrt(jnp.sum(v * v, axis=1)))

    # 1) Module-docstring-sized case: [bs=2, pre_k=8] (single full-array tile).
    x1 = jax.random.normal(k1, (2, 8), dtype=jnp.float32)
    out1 = normal_loss(x1)
    jax.block_until_ready(out1)
    assert jnp.allclose(out1, ref_loss(x1), rtol=1e-5, atol=1e-6), (out1, ref_loss(x1))

    # 2) Lane-packed path, multi-tile partials + ragged-tile mask:
    #    bs=2064, pre_k=8 -> 129 packed rows, tile=32 -> 5 parallel tiles.
    x2 = jax.random.normal(k2, (2064, 8), dtype=jnp.float32)
    out2 = normal_loss(x2, max_tile_rows=32)
    jax.block_until_ready(out2)
    assert jnp.allclose(out2, ref_loss(x2), rtol=1e-5, atol=1e-5), (out2, ref_loss(x2))

    # 3) Plain path (pre_k does not divide 128), multi-tile + mask: bs=1001, pre_k=24.
    x3 = jax.random.normal(k3, (1001, 24), dtype=jnp.float32)
    out3 = normal_loss(x3, max_tile_rows=64)
    jax.block_until_ready(out3)
    assert jnp.allclose(out3, ref_loss(x3), rtol=1e-5, atol=1e-5), (out3, ref_loss(x3))

    print("KERNEL_OK")
</pallas_src>

<mosaic_0001>
module attributes {stable_mosaic.version = 11 : i64} {
  func.func @_row_norm_kernel(%arg0: i32, %arg1: memref<2x8xf32, #tpu.memory_space<vmem>>, %arg2: memref<1x8x128xf32, #tpu.memory_space<vmem>>) attributes {dimension_semantics = [#tpu.dimension_semantics<parallel>], iteration_bounds = array<i64: 1>, scalar_prefetch = 0 : i64, scratch_operands = 0 : i64, tpu.core_type = #tpu.core_type<tc>, window_params = [{transform_indices = @transform_0, window_bounds = array<i64: 2, 8>}, {transform_indices = @transform_1, window_bounds = array<i64: 1, 8, 128>}]} {
    %c0 = arith.constant 0 : index
    %c0_0 = arith.constant 0 : index
    %0 = vector.load %arg1[%c0, %c0_0] : memref<2x8xf32, #tpu.memory_space<vmem>>, vector<2x8xf32>
    %1 = arith.mulf %0, %0 : vector<2x8xf32>
    %cst = arith.constant dense<0.000000e+00> : vector<2xf32>
    %2 = vector.multi_reduction <add>, %1, %cst [1] : vector<2x8xf32> to vector<2xf32>
    %3 = vector.shape_cast %2 : vector<2xf32> to vector<2x1xf32>
    %cst_1 = arith.constant 0.000000e+00 : f32
    %4 = vector.broadcast %cst_1 : f32 to vector<2x1xf32>
    %5 = arith.maximumf %3, %4 : vector<2x1xf32>
    %6 = math.sqrt %5 : vector<2x1xf32>
    %7 = vector.shape_cast %6 : vector<2x1xf32> to vector<1x2x1xf32>
    %cst_2 = arith.constant dense<0.000000e+00> : vector<1xf32>
    %8 = vector.multi_reduction <add>, %7, %cst_2 [1, 2] : vector<1x2x1xf32> to vector<1xf32>
    %9 = vector.shape_cast %8 : vector<1xf32> to vector<1x1x1xf32>
    %10 = vector.extract %9[0, 0, 0] : f32 from vector<1x1x1xf32>
    %11 = tpu.iota {dimensions = array<i32: 1>} : vector<1x8x128xi32>
    %12 = tpu.iota {dimensions = array<i32: 2>} : vector<1x8x128xi32>
    %c0_i32 = arith.constant 0 : i32
    %13 = vector.broadcast %c0_i32 : i32 to vector<1x8x128xi32>
    %14 = arith.cmpi eq, %11, %13 : vector<1x8x128xi32>
    %c0_i32_3 = arith.constant 0 : i32
    %15 = vector.broadcast %c0_i32_3 : i32 to vector<1x8x128xi32>
    %16 = arith.cmpi eq, %12, %15 : vector<1x8x128xi32>
    %17 = arith.andi %14, %16 : vector<1x8x128xi1>
    %cst_4 = arith.constant 0.000000e+00 : f32
    %18 = vector.broadcast %10 : f32 to vector<1x8x128xf32>
    %19 = vector.broadcast %cst_4 : f32 to vector<1x8x128xf32>
    %20 = arith.select %17, %18, %19 : vector<1x8x128xi1>, vector<1x8x128xf32>
    %c0_5 = arith.constant 0 : index
    %c0_6 = arith.constant 0 : index
    %c0_7 = arith.constant 0 : index
    %21 = vector.load %arg2[%c0_5, %c0_6, %c0_7] : memref<1x8x128xf32, #tpu.memory_space<vmem>>, vector<1x8x128xf32>
    tpu.vector_store %arg2[%c0_5, %c0_6, %c0_7], %20 {strides = array<i32>} : memref<1x8x128xf32, #tpu.memory_space<vmem>>, vector<1x8x128xf32>,
    return
  }
  func.func @transform_0(%arg0: i32) -> (i32, i32) {
    %c0_i32 = arith.constant 0 : i32
    %c0_i32_0 = arith.constant 0 : i32
    return %arg0, %c0_i32 : i32, i32
  }
  func.func @transform_1(%arg0: i32) -> (i32, i32, i32) {
    %c0_i32 = arith.constant 0 : i32
    %c0_i32_0 = arith.constant 0 : i32
    %c0_i32_1 = arith.constant 0 : i32
    return %arg0, %c0_i32, %c0_i32_0 : i32, i32, i32
  }
}

</mosaic_0001>

<bundles_post_ra>
// kernel: tpu_custom_call.1
= control target key start
LH: loop header
LB: loop body
LE: loop exit
PB: predicated region body
PF: predicated region fallthrough
CT: control target
= control target key end

     0   :  { %6 = vsyncpa [#allocation3], 0  ;;  %s161_s0 = inlined_call_operand.hbm [shape: f32[2,8], index: 0, kind: input, shape index: {}]   ;;  %s162_s1 = inlined_call_operand.hbm [shape: f32[1,8,128], index: 1, kind: output, shape index: {}]  }
   0x1   :  { %7 = vsyncpa [#allocation4], 0  ;;  %s125_s6 = smov [#allocation2]   ;;  %s77_s10 = scalar_lea.hbm %s161_s0, 32 }
   0x2   :  { %s14_s7 = sshll.u32 %s125_s6, 4  ;;  %p78_p0 = scmp.ne.s32.totalorder %s161_s0, %s77_s10  ;;  %s15_s7 = int_to_ptr.vmem [resolvable:$true] %s14_s7 }
   0x3   :  { %p81_p1 = scmp.lt.u32.totalorder %s77_s10, %s161_s0 }
   0x5   :  { %p83_p2 = pnand %p81_p1, %p78_p0 }
   0x7   :  { %86 = shalt.err (!%p83_p2)
}
   0x8   :  { %s87_s15 = scalar_lea.vmem %s15_s7, 32  ;;  %p92_p4 = scmp.lt.s32.totalorder %s15_s7, %s15_s7 }
   0x9   :  { %p88_p3 = scmp.ne.s32.totalorder %s15_s7, %s87_s15  ;;  %p93_p5 = scmp.lt.s32.totalorder %s87_s15, %s87_s15 }
   0xb   :  { %p94_p6 = por %p93_p5, %p92_p4 }
   0xd   :  { %p95_p7 = pnand %p94_p6, %p88_p3 }
   0xf   :  { %98 = shalt.err (!%p95_p7)
}
  0x10   :  { %17 = dma.hbm_to_vmem [thread:$0]  %s161_s0, 32, %s15_s7, [#allocation3]  }
  0x11   :  { %121 = dma.done.wait [#allocation3], 32  }
  0x12   :  { %122 = vsyncadd [#allocation3], 4294967264  ;;  %v21_v0 = vld [vmem:[#allocation2] sm:$0x3]  ;;  %vm23_vm0 = vcmask 58368   ;;  %vm35_vm2 = vcmask 1024   ;;  %v46_v18 = vlaneseq }
  0x13   :  { %v22_v1 = vmul.f32 %v21_v0, %v21_v0  ;;  %s126_s0 = smov [#allocation5]  }
  0x14   :  { %v47_v19 = vshrl.u32 %v46_v18, 7  ;;  %v49_v20 = vand.u32 127, %v46_v18  ;;  %s62_s18 = sshll.u32 %s126_s0, 4  ;;  %s63_s18 = int_to_ptr.vmem [resolvable:$true] %s62_s18 }
  0x15   :  { %v24_v2 = vsel %vm23_vm0, %v22_v1, 0.0  ;;  %s99_s20 = scalar_lea.vmem %s63_s18, 128  ;;  %p104_p9 = scmp.lt.s32.totalorder %s63_s18, %s63_s18 }
  0x16   :  { %25 = vadd.xlane.f32.xlu0 %v24_v2  ;;  %vm50_vm4 = vcmp.eq.s32.totalorder %v47_v19, 0  ;;  %vm51_vm5 = vcmp.eq.s32.totalorder %v49_v20, 0  ;;  %p100_p8 = scmp.ne.s32.totalorder %s63_s18, %s99_s20  ;;  %p105_p10 = scmp.lt.s32.totalorder %s99_s20, %s99_s20 }
  0x17   :  { %vm52_vm6 = vmand %vm50_vm4, %vm51_vm5 }
  0x18   :  { %p106_p11 = por %p105_p10, %p104_p9 }
  0x1a   :  { %p107_p12 = pnand %p106_p11, %p100_p8 }
  0xa3   :  { %v26_v3 = vpop.xlane.xlu0 %25 }
  0xa4   :  { %v27_v4 = vmax.f32 %v26_v3, 0.0 }
  0xa6   :  { %75 = vrsqrt.f32 %v27_v4  ;;  %vm30_vm1 = vcmp.eq.f32.partialorder %v27_v4, inf  ;;  %v33_v7 = vand.u32 2147483648, %v27_v4  ;;  %vm32_vm3 = vcmp.eq.f32.partialorder %v27_v4, 0.0 }
  0xb0   :  { %v76_v5 = vpop.eup %75 }
  0xb1   :  { %v29_v6 = vmul.f32 %v76_v5, %v27_v4 }
  0xb3   :  { %v31_v8 = vsel %vm30_vm1, %v27_v4, %v29_v6 }
  0xb4   :  { %v34_v9 = vsel %vm32_vm3, %v33_v7, %v31_v8 }
  0xb5   :  { %v36_v10 = vsel %vm35_vm2, %v34_v9, 0.0 }
  0xb6   :  { %37 = vadd.xlane.f32.xlu0 %v36_v10 }
 0x143   :  { %v38_v11 = vpop.xlane.xlu0 %37 }
 0x144   :  { %v39_v12 = vrot.slane %v38_v11, 4 }
 0x146   :  { %v40_v13 = vadd.f32 %v39_v12, %v38_v11 }
 0x148   :  { %v41_v14 = vrot.slane %v40_v13, 2 }
 0x14a   :  { %v42_v15 = vadd.f32 %v41_v14, %v40_v13 }
 0x14c   :  { %v43_v16 = vrot.slane %v42_v15, 1 }
 0x14e   :  { %v44_v17 = vadd.f32 %v43_v16, %v42_v15 }
 0x150   :  { %71 = vpush %v44_v17 }
 0x181   :  { %s72_s19 = spop %71 }
 0x182   :  { %v53_v21 = vstv %s72_s19 }
 0x183   :  { %v54_v22 = vsel %vm52_vm6, %v53_v21, 0.0 }
 0x184   :  { %55 = vst [vmem:[#allocation5] sm:$0xff] %v54_v22 }
 0x185   :  { %110 = shalt.err (!%p107_p12)
}
 0x186   :  { %s111_s23 = scalar_lea.hbm %s162_s1, 128 }
 0x187   :  { %p112_p13 = scmp.ne.s32.totalorder %s162_s1, %s111_s23  ;;  %p115_p0 = scmp.lt.u32.totalorder %s111_s23, %s162_s1 }
 0x189   :  { %p117_p1 = pnand %p115_p0, %p112_p13 }
 0x18b   :  { %120 = shalt.err (!%p117_p1)
}
 0x18c   :  { %65 = dma.vmem_to_hbm [thread:$0]  %s63_s18, 128, %s162_s1, [#allocation4]  }
 0x18d   :  { %123 = dma.done.wait [#allocation4], 128  }
 0x18e   :  { %124 = vsyncadd [#allocation4], 4294967168 }
 0x18f   :  { %69 = vsyncpa [#allocation3], 1 }
 0x190   :  { %70 = vsyncpa [#allocation4], 1 }

</bundles_post_ra>
